<compile_context>
chip_gen: v7x
topology: tpu7x:2x2x1
jax: 0.10.0
libtpu: 0.0.40
codegen_flags: <defaults>
</compile_context>

<pallas_src>
import functools

import jax
import jax.numpy as jnp
from jax.experimental import pallas as pl
from jax.experimental.pallas import tpu as pltpu


# ----------------------------- kernels --------------------------------------


def _fused_kernel(x_ref, w1t_ref, w2t_ref, o_ref, *, inv_hw):
    """One image per grid step: mean -> fc1 -> relu -> fc2 -> sigmoid -> scale.

    x_ref/o_ref: (1, C, HW) in the native dtype (whole-image slab resident).
    w1t_ref: (C, C_r); w2t_ref: (C_r, C).
    """
    x = x_ref[...]                                                  # (1, C, HW)
    avg = jnp.sum(x, axis=-1, dtype=jnp.float32) * inv_hw           # (1, C)
    h = jnp.maximum(
        jnp.dot(avg, w1t_ref[...].astype(jnp.float32),
                preferred_element_type=jnp.float32), 0.0)           # (1, C_r)
    s = jax.nn.sigmoid(
        jnp.dot(h, w2t_ref[...].astype(jnp.float32),
                preferred_element_type=jnp.float32))                # (1, C)
    o_ref[...] = x * s[:, :, None].astype(x.dtype)


def _sum_kernel(x_ref, sum_ref, *, hw, thw, need_mask):
    """Streaming spatial-sum pass.

    x_ref: (1, C, thw) native dtype; sum_ref: (1, C, 1) f32 accumulator that
    stays resident across the spatial-tile axis (same output block index).
    The ragged last tile is masked in-kernel (no jnp.pad round trip in HBM).
    """
    t = pl.program_id(1)

    @pl.when(t == 0)
    def _():
        sum_ref[...] = jnp.zeros_like(sum_ref)

    x = x_ref[...]
    if need_mask:
        limit = hw - t * thw                       # >= thw for full tiles
        idx = jax.lax.broadcasted_iota(jnp.int32, x.shape, dimension=2)
        x = jnp.where(idx < limit, x, jnp.zeros_like(x))
    sum_ref[...] += jnp.sum(x, axis=-1, keepdims=True, dtype=jnp.float32)


def _scale_kernel(s_ref, x_ref, o_ref):
    """Streaming broadcast multiply: (1,C,1) scale times (1,C,thw) tile.

    Garbage lanes read in a partial edge block are never written back
    (Pallas masks OOB stores of the partial output block)."""
    o_ref[...] = x_ref[...] * s_ref[...]


# ----------------------------- sizing helpers --------------------------------


def _round_up(x, m):
    return ((x + m - 1) // m) * m


def _tpu_vmem_bytes():
    """Physical VMEM per TensorCore (64 MiB on v7x, 128 MiB on v5e/v6e)."""
    try:
        info = pltpu.get_tpu_info()
        vmem = getattr(info, "vmem_capacity_bytes", None)
        if vmem:
            return int(vmem)
    except Exception:
        pass
    return 128 * 1024 * 1024


def _budgets():
    vmem = _tpu_vmem_bytes()
    # Scoped-VMEM limit for the pallas_calls (well above the 16/32 MiB
    # defaults, with headroom below physical).
    vmem_limit = min(int(vmem * 3 // 4), 100 * 1024 * 1024)
    # Fused path keeps in+out double-buffered (~4x slab) + weights resident.
    fused_slab_budget = min(vmem // 6, 20 * 1024 * 1024)
    # Streaming scale pass: 2 streams x 2 buffers = ~4x block.
    block_budget = min(vmem // 8, 12 * 1024 * 1024)
    return vmem_limit, fused_slab_budget, block_budget


def _spatial_tile(C, HW, itemsize, block_budget):
    """Lane-dense (multiple of 128) spatial tile sized against block_budget."""
    lanes = (block_budget // max(1, C * itemsize)) // 128 * 128
    lanes = max(128, lanes)
    return min(_round_up(HW, 128), lanes)


# ----------------------------- wrapper ---------------------------------------


@functools.partial(jax.jit, static_argnames=("force_multipass",))
def ca_forward(x, w1, w2, force_multipass=False):
    """x: (B, C, H, W); w1: (C_r, C); w2: (C, C_r). Matches CA.forward."""
    B, C, H, W = x.shape
    C_r = w1.shape[0]
    HW = H * W
    dtype = x.dtype
    itemsize = jnp.dtype(dtype).itemsize

    vmem_limit, fused_slab_budget, block_budget = _budgets()
    slab_bytes = C * HW * itemsize

    x_flat = x.reshape(B, C, HW)            # free: contiguous metadata reshape

    # ---------------- fused single-pass path (the common case) --------------
    if (not force_multipass) and slab_bytes <= fused_slab_budget:
        out_flat = pl.pallas_call(
            functools.partial(_fused_kernel, inv_hw=1.0 / HW),
            out_shape=jax.ShapeDtypeStruct((B, C, HW), dtype),
            grid_spec=pltpu.PrefetchScalarGridSpec(
                num_scalar_prefetch=0,
                grid=(B,),
                in_specs=[
                    pl.BlockSpec((1, C, HW), lambda b: (b, 0, 0)),
                    pl.BlockSpec((C, C_r), lambda b: (0, 0)),
                    pl.BlockSpec((C_r, C), lambda b: (0, 0)),
                ],
                out_specs=pl.BlockSpec((1, C, HW), lambda b: (b, 0, 0)),
            ),
            compiler_params=pltpu.CompilerParams(
                dimension_semantics=("parallel",),
                vmem_limit_bytes=vmem_limit),
        )(x_flat, jnp.transpose(w1), jnp.transpose(w2))
        return out_flat.reshape(B, C, H, W)

    # ---------------- streaming fallback (huge C*HW slabs) ------------------
    thw = _spatial_tile(C, HW, itemsize, block_budget)
    n_t = pl.cdiv(HW, thw)
    need_mask = (HW % thw) != 0

    # Pass 1: per-(B, C) spatial sums in f32, tiled over HW, no padding.
    sums = pl.pallas_call(
        functools.partial(_sum_kernel, hw=HW, thw=thw, need_mask=need_mask),
        out_shape=jax.ShapeDtypeStruct((B, C, 1), jnp.float32),
        grid_spec=pltpu.PrefetchScalarGridSpec(
            num_scalar_prefetch=0,
            grid=(B, n_t),
            in_specs=[pl.BlockSpec((1, C, thw), lambda b, t: (b, 0, t))],
            out_specs=pl.BlockSpec((1, C, 1), lambda b, t: (b, 0, 0)),
        ),
        compiler_params=pltpu.CompilerParams(
            dimension_semantics=("parallel", "arbitrary"),
            vmem_limit_bytes=vmem_limit),
    )(x_flat)

    # Tiny FC chain (M=B, K=C) badly under-fills the MXU; run it as plain jnp
    # instead of a dedicated pallas_call (negligible work, one less launch).
    avg = sums.reshape(B, C) * (1.0 / HW)
    h = jnp.maximum(avg @ w1.T.astype(jnp.float32), 0.0)
    s = jax.nn.sigmoid(h @ w2.T.astype(jnp.float32)).astype(dtype)

    # Pass 2: channel-wise scaling, tiled over HW, fully parallel grid.
    out_flat = pl.pallas_call(
        _scale_kernel,
        out_shape=jax.ShapeDtypeStruct((B, C, HW), dtype),
        grid_spec=pltpu.PrefetchScalarGridSpec(
            num_scalar_prefetch=0,
            grid=(B, n_t),
            in_specs=[
                pl.BlockSpec((1, C, 1), lambda b, t: (b, 0, 0)),
                pl.BlockSpec((1, C, thw), lambda b, t: (b, 0, t)),
            ],
            out_specs=pl.BlockSpec((1, C, thw), lambda b, t: (b, 0, t)),
        ),
        compiler_params=pltpu.CompilerParams(
            dimension_semantics=("parallel", "parallel"),
            vmem_limit_bytes=vmem_limit),
    )(s.reshape(B, C, 1), x_flat)

    return out_flat.reshape(B, C, H, W)


# ----------------------------- reference & test ------------------------------


def _ca_reference(x, w1, w2):
    """Pure-JAX reference matching the PyTorch forward exactly."""
    avg = jnp.mean(x, axis=(2, 3))                 # (B, C)
    h = jnp.maximum(avg @ w1.T, 0.0)               # (B, C_r)
    s = jax.nn.sigmoid(h @ w2.T)                   # (B, C)
    return x * s[:, :, None, None]


if __name__ == "__main__":
    # Small shapes consistent with the module: batch=2, channels=4, spatial=16.
    B, C, H, W = 2, 4, 16, 16
    reduction = 1
    C_r = C // reduction

    key = jax.random.PRNGKey(0)
    kx, k1, k2, kx2 = jax.random.split(key, 4)

    x = jax.random.normal(kx, (B, C, H, W), dtype=jnp.float32)
    # Deterministic synthetic weights (nn.Linear layout: (out, in), no bias).
    w1 = jax.random.normal(k1, (C_r, C), dtype=jnp.float32) * 0.1
    w2 = jax.random.normal(k2, (C, C_r), dtype=jnp.float32) * 0.1

    ref = _ca_reference(x, w1, w2)

    # Fused single-pass path (default dispatch for small slabs).
    out = jax.block_until_ready(ca_forward(x, w1, w2))
    assert out.shape == (B, C, H, W)
    assert jnp.allclose(out, ref, atol=1e-5, rtol=1e-5), "fused path mismatch"

    # Streaming (reduce + scale) fallback path at the same shape.
    out_mp = jax.block_until_ready(ca_forward(x, w1, w2, force_multipass=True))
    assert jnp.allclose(out_mp, ref, atol=1e-5, rtol=1e-5), "multipass mismatch"

    # Ragged spatial size exercises the in-kernel mask + masked partial writes.
    x_r = jax.random.normal(kx2, (B, C, 13, 13), dtype=jnp.float32)
    out_r = jax.block_until_ready(ca_forward(x_r, w1, w2, force_multipass=True))
    ref_r = _ca_reference(x_r, w1, w2)
    assert jnp.allclose(out_r, ref_r, atol=1e-5, rtol=1e-5), "ragged mismatch"

    print("KERNEL_OK")
</pallas_src>

<mosaic_0001>
module attributes {stable_mosaic.version = 11 : i64} {
  func.func @_fused_kernel(%arg0: i32, %arg1: memref<1x4x256xf32, #tpu.memory_space<vmem>>, %arg2: memref<4x4xf32, #tpu.memory_space<vmem>>, %arg3: memref<4x4xf32, #tpu.memory_space<vmem>>, %arg4: memref<1x4x256xf32, #tpu.memory_space<vmem>>) attributes {dimension_semantics = [#tpu.dimension_semantics<parallel>], iteration_bounds = array<i64: 2>, scalar_prefetch = 0 : i64, scratch_operands = 0 : i64, tpu.core_type = #tpu.core_type<tc>, window_params = [{transform_indices = @transform_0, window_bounds = array<i64: 1, 4, 256>}, {pipeline_mode = #tpu.pipeline_mode<synchronous>, transform_indices = @transform_1, window_bounds = array<i64: 4, 4>}, {pipeline_mode = #tpu.pipeline_mode<synchronous>, transform_indices = @transform_2, window_bounds = array<i64: 4, 4>}, {transform_indices = @transform_3, window_bounds = array<i64: 1, 4, 256>}]} {
    %c0 = arith.constant 0 : index
    %c0_0 = arith.constant 0 : index
    %c0_1 = arith.constant 0 : index
    %0 = vector.load %arg1[%c0, %c0_0, %c0_1] : memref<1x4x256xf32, #tpu.memory_space<vmem>>, vector<1x4x256xf32>
    %cst = arith.constant dense<0.000000e+00> : vector<1x4xf32>
    %1 = vector.multi_reduction <add>, %0, %cst [2] : vector<1x4x256xf32> to vector<1x4xf32>
    %cst_2 = arith.constant 3.906250e-03 : f32
    %2 = vector.broadcast %cst_2 : f32 to vector<1x4xf32>
    %3 = arith.mulf %1, %2 : vector<1x4xf32>
    %c0_3 = arith.constant 0 : index
    %c0_4 = arith.constant 0 : index
    %4 = vector.load %arg2[%c0_3, %c0_4] : memref<4x4xf32, #tpu.memory_space<vmem>>, vector<4x4xf32>
    %cst_5 = arith.constant dense<0.000000e+00> : vector<1x4xf32>
    %5 = tpu.matmul %3, %4, %cst_5 {dimension_numbers = #tpu.dot_dimension_numbers<[1], [0], [0], [1], [0, 0, 1, 1], [], []>} : vector<1x4xf32>, vector<4x4xf32>, vector<1x4xf32> -> vector<1x4xf32>
    %cst_6 = arith.constant 0.000000e+00 : f32
    %6 = vector.broadcast %cst_6 : f32 to vector<1x4xf32>
    %7 = arith.maximumf %5, %6 : vector<1x4xf32>
    %c0_7 = arith.constant 0 : index
    %c0_8 = arith.constant 0 : index
    %8 = vector.load %arg3[%c0_7, %c0_8] : memref<4x4xf32, #tpu.memory_space<vmem>>, vector<4x4xf32>
    %cst_9 = arith.constant dense<0.000000e+00> : vector<1x4xf32>
    %9 = tpu.matmul %7, %8, %cst_9 {dimension_numbers = #tpu.dot_dimension_numbers<[1], [0], [0], [1], [0, 0, 1, 1], [], []>} : vector<1x4xf32>, vector<4x4xf32>, vector<1x4xf32> -> vector<1x4xf32>
    %10 = arith.negf %9 : vector<1x4xf32>
    %11 = math.exp %10 : vector<1x4xf32>
    %cst_10 = arith.constant 1.000000e+00 : f32
    %12 = vector.broadcast %cst_10 : f32 to vector<1x4xf32>
    %13 = arith.addf %12, %11 : vector<1x4xf32>
    %14 = arith.divf %12, %13 : vector<1x4xf32>
    %15 = vector.shape_cast %14 : vector<1x4xf32> to vector<1x4x1xf32>
    %16 = vector.broadcast %15 : vector<1x4x1xf32> to vector<1x4x256xf32>
    %17 = arith.mulf %0, %16 : vector<1x4x256xf32>
    %c0_11 = arith.constant 0 : index
    %c0_12 = arith.constant 0 : index
    %c0_13 = arith.constant 0 : index
    %18 = vector.load %arg4[%c0_11, %c0_12, %c0_13] : memref<1x4x256xf32, #tpu.memory_space<vmem>>, vector<1x4x256xf32>
    tpu.vector_store %arg4[%c0_11, %c0_12, %c0_13], %17 {strides = array<i32>} : memref<1x4x256xf32, #tpu.memory_space<vmem>>, vector<1x4x256xf32>,
    return
  }
  func.func @transform_0(%arg0: i32) -> (i32, i32, i32) {
    %c0_i32 = arith.constant 0 : i32
    %c0_i32_0 = arith.constant 0 : i32
    %c0_i32_1 = arith.constant 0 : i32
    return %arg0, %c0_i32, %c0_i32_0 : i32, i32, i32
  }
  func.func @transform_1(%arg0: i32) -> (i32, i32) {
    %c0_i32 = arith.constant 0 : i32
    %c0_i32_0 = arith.constant 0 : i32
    %c0_i32_1 = arith.constant 0 : i32
    return %c0_i32, %c0_i32_0 : i32, i32
  }
  func.func @transform_2(%arg0: i32) -> (i32, i32) {
    %c0_i32 = arith.constant 0 : i32
    %c0_i32_0 = arith.constant 0 : i32
    %c0_i32_1 = arith.constant 0 : i32
    return %c0_i32, %c0_i32_0 : i32, i32
  }
  func.func @transform_3(%arg0: i32) -> (i32, i32, i32) {
    %c0_i32 = arith.constant 0 : i32
    %c0_i32_0 = arith.constant 0 : i32
    %c0_i32_1 = arith.constant 0 : i32
    return %arg0, %c0_i32, %c0_i32_0 : i32, i32, i32
  }
}

</mosaic_0001>

<bundles_post_ra>
// kernel: ca_forward.1
= control target key start
LH: loop header
LB: loop body
LE: loop exit
PB: predicated region body
PF: predicated region fallthrough
CT: control target
= control target key end

     0   :  { %8 = vsyncpa [#allocation3], 0  ;;  %s1045_s0 = inlined_call_operand.hbm [shape: f32[2,4,256], index: 0, kind: input, shape index: {}]   ;;  %s1046_s1 = inlined_call_operand.hbm [shape: f32[4,4], index: 1, kind: input, shape index: {}]   ;;  %s1047_s2 = inlined_call_operand.hbm [shape: f32[4,4], index: 2, kind: input, shape index: {}]   ;;  %s1048_s3 = inlined_call_operand.hbm [shape: f32[2,4,256], index: 3, kind: output, shape index: {}]  }
   0x1   :  { %10 = vsyncpa [#allocation3 + $0x1], 0 }
   0x2   :  { %11 = vsyncpa [#allocation6], 0 }
   0x3   :  { %12 = vsyncpa [#allocation4], 0 }
   0x4   :  { %14 = vsyncpa [#allocation4 + $0x1], 0  ;;  %s812_s12 = smov 0   ;;  %s814_s13 = smov 0  }
   0x5   :  { %s816_s14 = smov 0   ;;  %s818_s15 = smov 0  }
   0x6 LB: > { %s833_s16 = sadd.s32 4294967295, %s783_s15   ;;  %s513_s17 = sadd.s32 4294967294, %s783_s15   ;;  %s783_s15 = sphi %s818_s15, %s1068_s15   ;;  %s779_s14 = sphi %s816_s14, %s1067_s14   ;;  %s775_s13 = sphi %s814_s13, %s1066_s13   ;;  %s771_s12 = sphi %s812_s12, %s1065_s12  }
   0x7   : > { %p40_p0 = scmp.ne.s32.totalorder %s775_s13, %s771_s12  ;;  %p1049_p1 = scmp.eq.s32.totalorder %s833_s16, 0 }
   0x8   : > { %p112_p3 = scmp.eq.s32.totalorder %s513_s17, 1  ;;  %p514_p5 = scmp.ge.s32.totalorder %s783_s15, 1 }
   0x9   : > { %p842_p4 = por %p1049_p1, %p40_p0  ;;  %p119_p7 = scmp.lt.s32.totalorder %s783_s15, 3 }
   0xa   : > { %p847_p6 = por %p112_p3, %p40_p0  ;;  %s785_s21 = smov [#allocation5]  }
   0xb   : > { %s1052_s18 = scalar_select %p842_p4, 1, 0 }
   0xc   : > { %s1053_s19 = scalar_select %p847_p6, 1, 0 }
   0xd   : > { %p852_p8 = pnand %p514_p5, %p119_p7  ;;  %s132_s22 = sshll.u32 %s785_s21, 4  ;;  %s133_s22 = int_to_ptr.vmem [resolvable:$true] %s132_s22 }
   0xe   : > { %s786_s23 = smov [#allocation7]   ;;  %s868_s26 = sadd.s32 1, %s783_s15  }
   0xf   : > { %s1054_s20 = scalar_select %p852_p8, 1, 0 }
  0x10   : > { %p564_p10 = pneg %p852_p8  ;;  %s143_s24 = sshll.u32 %s786_s23, 4  ;;  %s865_s24 = int_to_ptr.vmem [resolvable:$true] %s143_s24 }
  0x11   : > { %s24_s27 = ssub.s32 %s783_s15, %s868_s26  ;;  %s627_s30 = scalar_lea.hbm %s1046_s1, 64 }
  0x12   : > { %p861_p11 = pnand %p564_p10, %p1049_p1  ;;  %p628_p12 = scmp.ne.s32.totalorder %s1046_s1, %s627_s30 }
  0x13   : > { %p634_p5 = scmp.lt.u32.totalorder %s627_s30, %s1046_s1 }
  0x14   : > { %p629_p13 = pneg %p861_p11 }
  0x16   : > { %p630_p0 = pnand %p629_p13, %p628_p12 }
  0x18   : > { %p631_p3 = pneg %p630_p0 }
  0x1a   : > { %p636_p7 = pnand %p634_p5, %p631_p3 }
  0x1c   : > { %639 = shalt.err (!%p636_p7)
}
  0x1d   : > { %s640_s8 = scalar_lea.vmem %s133_s22, 64  ;;  %p648_p2 = scmp.lt.s32.totalorder %s133_s22, %s133_s22 }
  0x1e   : > { %p641_p10 = scmp.ne.s32.totalorder %s133_s22, %s640_s8  ;;  %p649_p6 = scmp.lt.s32.totalorder %s640_s8, %s640_s8 }
  0x20   : > { %p643_p9 = pnand %p641_p10, %p629_p13  ;;  %p650_p4 = por %p649_p6, %p648_p2 }
  0x22   : > { %p644_p1 = pneg %p643_p9 }
  0x24   : > { %p651_p8 = pnand %p650_p4, %p644_p1 }
  0x26   : > { %654 = shalt.err (!%p651_p8)
}
  0x27   : > { %567 = dma.hbm_to_vmem [thread:$0]  (!%p861_p11), %s1046_s1, 64, %s133_s22, [#allocation6]  }
  0x28   : > { %s655_s21 = scalar_lea.hbm %s1047_s2, 64 }
  0x29   : > { %p656_p9 = scmp.ne.s32.totalorder %s1047_s2, %s655_s21  ;;  %p662_p4 = scmp.lt.u32.totalorder %s655_s21, %s1047_s2 }
  0x2b   : > { %p658_p2 = pnand %p656_p9, %p629_p13 }
  0x2d   : > { %p659_p1 = pneg %p658_p2 }
  0x2f   : > { %p664_p6 = pnand %p662_p4, %p659_p1 }
  0x31   : > { %667 = shalt.err (!%p664_p6)
}
  0x32   : > { %s668_s22 = scalar_lea.vmem %s865_s24, 64  ;;  %p676_p3 = scmp.lt.s32.totalorder %s865_s24, %s865_s24 }
  0x33   : > { %p669_p8 = scmp.ne.s32.totalorder %s865_s24, %s668_s22  ;;  %p677_p5 = scmp.lt.s32.totalorder %s668_s22, %s668_s22 }
  0x35   : > { %p671_p12 = pnand %p669_p8, %p629_p13  ;;  %p678_p7 = por %p677_p5, %p676_p3 }
  0x37   : > { %p672_p0 = pneg %p671_p12 }
  0x39   : > { %p679_p10 = pnand %p678_p7, %p672_p0 }
  0x3b   : > { %682 = shalt.err (!%p679_p10)
}
  0x3c   : > { %570 = dma.hbm_to_vmem [thread:$0]  (!%p861_p11), %s1047_s2, 64, %s865_s24, [#allocation6]  }
  0x3d   : > { %p25_p13 = scmp.eq.s32.totalorder %s24_s27, 0  ;;  %s27_s6 = sadd.s32 1, %s779_s14 }
  0x3e   : > { %p34_p9 = scmp.ne.s32.totalorder %s779_s14, %s775_s13  ;;  %p35_p2 = scmp.eq.s32.totalorder %s783_s15, 0 }
  0x3f   : > { %s927_s25 = scalar_select %p25_p13, %s779_s14, %s27_s6  }
  0x40   : > { %p36_p1 = por %p35_p2, %p34_p9  ;;  %p1056_p4 = scmp.eq.s32.totalorder %s833_s16, 1 }
  0x41   : > { %p581_p8 = scmp.lt.s32.totalorder %s783_s15, 2  ;;  %s154_s8 = sand.u32 1, %s779_s14  }
  0x42   : > { %p931_p6 = por %p1056_p4, %p34_p9  ;;  %s518_s9 = sshll.u32 %s154_s8, 3 }
  0x43   : > { %s536_s10 = sshll.u32 %s783_s15, 7  ;;  %s158_s27 = scalar_lea.vmem [#allocation2], %s518_s9 }
  0x44   : > { %s941_s24 = scalar_lea.hbm %s1045_s0, %s536_s10  ;;  %s166_s21 = sshll.u32 %s158_s27, 4  ;;  %s943_s21 = int_to_ptr.vmem [resolvable:$true] %s166_s21 }
  0x45   : > { %p945_p11 = pnand %p581_p8, %p36_p1  ;;  %s155_s28 = scalar_lea.sflag [#allocation3], %s154_s8 }
  0x46   : > { %s683_s29 = scalar_lea.hbm %s941_s24, 128  ;;  %s688_s4 = scalar_lea.hbm %s1045_s0, 256 }
  0x47   : > { %p684_p12 = scmp.ne.s32.totalorder %s941_s24, %s683_s29  ;;  %p685_p0 = pneg %p945_p11 }
  0x48   : > { %p689_p7 = scmp.lt.u32.totalorder %s941_s24, %s1045_s0  ;;  %p690_p10 = scmp.lt.u32.totalorder %s688_s4, %s683_s29 }
  0x49   : > { %p686_p3 = pnand %p685_p0, %p684_p12  ;;  %p692_p9 = scmp.lt.u32.totalorder %s683_s29, %s941_s24 }
  0x4a   : > { %p691_p13 = por %p690_p10, %p689_p7 }
  0x4b   : > { %p687_p5 = pneg %p686_p3 }
  0x4c   : > { %p693_p2 = por %p692_p9, %p691_p13 }
  0x4e   : > { %p694_p1 = pnand %p693_p2, %p687_p5 }
  0x50   : > { %697 = shalt.err (!%p694_p1)
}
  0x51   : > { %s698_s8 = scalar_lea.vmem %s943_s21, 128  ;;  %s787_s9 = smov [#allocation2]  }
  0x52   : > { %p699_p4 = scmp.ne.s32.totalorder %s943_s21, %s698_s8  ;;  %s703_s10 = sshll.u32 %s787_s9, 4  ;;  %s704_s10 = int_to_ptr.vmem [resolvable:$false] %s703_s10 }
  0x53   : > { %s705_s11 = scalar_lea.vmem %s704_s10, 256  ;;  %p706_p3 = scmp.lt.s32.totalorder %s943_s21, %s704_s10 }
  0x54   : > { %p701_p8 = pnand %p699_p4, %p685_p0  ;;  %p707_p7 = scmp.lt.s32.totalorder %s705_s11, %s698_s8 }
  0x56   : > { %p702_p12 = pneg %p701_p8  ;;  %p708_p10 = por %p707_p7, %p706_p3 }
  0x58   : > { %p709_p13 = pnand %p708_p10, %p702_p12 }
  0x5a   : > { %712 = shalt.err (!%p709_p13)
}
  0x5b   : > { %574 = dma.hbm_to_vmem [thread:$0]  (!%p945_p11), %s941_s24, 128, %s943_s21, %s155_s28  }
  0x5c   : > { %p1059_p5 = scmp.ne.s32.totalorder %s1054_s20, 0 }
  0x5d   : > { %s977_s17 = sand.u32 (!%p1059_p5), 1, %s775_s13   ;;  %p1060_p0 = scmp.ne.s32.totalorder (!%p1059_p5), %s1052_s18, 0 }
  0x5e   : > { %175 = sbr.rel (%p1059_p5) target bundleno = 844 (0x34c), region = 32  ;;  %s522_s27 = sshll.u32 (!%p1059_p5), %s977_s17, 3 }
  0x5f   : > { %s178_s29 = scalar_lea.sflag (!%p1059_p5), [#allocation3], %s977_s17  ;;  %s181_s30 = scalar_lea.vmem (!%p1059_p5), [#allocation2], %s522_s27 }
  0x65   : > { %758 = dma.done.wait (%p1060_p0), %s178_s29, 128  }
  0x66   : > { %760 = vsyncadd (%p1060_p0), %s178_s29, 4294967168  ;;  %p1061_p11 = scmp.eq.s32.totalorder %s833_s16, 0 }
  0x68   : > { %762 = dma.done.wait (%p1061_p11), [#allocation6], 128   ;;  %p1062_p9 = pmov %p1061_p11 }
  0x69   : > { %vm216_vm0 = vcmask 1043456   ;;  %v212_v0 = vld [vmem:[%s181_s30] sm:$0xff]  ;;  %v788_v5 = vmov 0.0   ;;  %v223_v6 = vld [vmem:[#allocation5] sm:$0xf]  ;;  %vm789_vm1 = vmmov 0   ;;  %v225_v7 = vlaneseq }
  0x6a   : > { %764 = vsyncadd (%p1062_p9), [#allocation6], 4294967168  ;;  %v214_v1 = vcombine.high %v212_v0, %v212_v0  ;;  %v217_v2 = vsel %vm216_vm0, %v212_v0, 0.0  ;;  %542 = vmatprep.subr.mxu0 %v788_v5  ;;  %547 = vmatprep.subr.mxu1 %v788_v5  ;;  %vm231_vm2 = vcmask 31744   ;;  %v308_v14 = vld [vmem:[#allocation7] sm:$0xf] }
  0x6b   : > { %543 = vmatpush3.msk.msra.mxu0 %vm216_vm0, %v223_v6  ;;  %544 = vmatprep.mubr.msk.f32.mxu0 %vm789_vm1, %v788_v5  ;;  %v226_v8 = vand.u32 127, %v225_v7  ;;  %v228_v9 = vshrl.u32 %v225_v7, 7  ;;  %v790_v26 = vmov 839922192   ;;  %s537_s18 = sshll.u32 %s833_s16, 7  ;;  %s211_s20 = scalar_lea.vmem [#allocation8], %s522_s27 }
  0x6c   : > { %v218_v3 = vsel %vm216_vm0, %v214_v1, 0.0  ;;  %549 = vmatprep.mubr.msk.f32.mxu1 %vm789_vm1, %v788_v5  ;;  %548 = vmatpush3.msk.msra.mxu1 %vm216_vm0, %v308_v14  ;;  %v400_v27 = vunpack.c.l.s4 %v790_v26  ;;  %s424_s24 = sshll.u32 %s211_s20, 4  ;;  %s1001_s28 = scalar_lea.hbm %s1048_s3, %s537_s18  ;;  %s1003_s24 = int_to_ptr.vmem [resolvable:$true] %s424_s24 }
  0x6d   : > { %v219_v4 = vadd.f32 %v218_v3, %v217_v2  ;;  %v229_v10 = vsub.s32 %v226_v8, %v228_v9  ;;  %v393_v23 = vsub.s32 0, %v228_v9  ;;  %s410_s22 = scalar_lea.sflag [#allocation4], %s977_s17  ;;  %s713_s4 = scalar_lea.vmem %s1003_s24, 128 }
  0x6e   : > { %v401_v28 = vunpack.c.0.s8 %v400_v27  ;;  %p714_p2 = scmp.ne.s32.totalorder %s1003_s24, %s713_s4  ;;  %s791_s16 = smov [#allocation8]  }
  0x6f   : > { %220 = vadd.xlane.f32.xlu0 %v219_v4  ;;  %s717_s5 = sshll.u32 %s791_s16, 4  ;;  %s718_s5 = int_to_ptr.vmem [resolvable:$false] %s717_s5 }
  0x70   : > { %v404_v29 = vsub.s32 %v401_v28, %v228_v9  ;;  %p715_p1 = pnand %p714_p2, %p931_p6  ;;  %s719_s6 = scalar_lea.vmem %s718_s5, 256 }
  0x71   : > { %p720_p8 = scmp.lt.s32.totalorder %s1003_s24, %s718_s5  ;;  %p721_p12 = scmp.lt.s32.totalorder %s719_s6, %s713_s4 }
  0x72   : > { %p716_p4 = pneg %p715_p1 }
  0x73   : > { %p722_p3 = por %p721_p12, %p720_p8 }
  0x75   : > { %p723_p7 = pnand %p722_p3, %p716_p4 }
  0xfc   : > { %v221_v11 = vpop.xlane.xlu0 %220 }
  0xfd   : > { %v222_v12 = vmul.f32 0.00390625, %v221_v11 }
  0xff   : > { %v230_v13 = vrot.slane %v222_v12, %v229_v10 }
 0x101   : > { %545 = vmatmul.mubr.msk.f32.vlgmr.msra.gmra.mrb[0].mxu0 %vm231_vm2, %v230_v13 }
 0x1d4   : > { %v303_v15 = vpop.f32.mrb[0].mxu0 }
 0x1d5   : > { %v307_v16 = vmax.f32 %v303_v15, 0.0  ;;  %v546_v17 = vpop.f32.mrb[1].mxu0 }
 0x1d7   : > { %550 = vmatmul.mubr.msk.f32.vlgmr.msra.gmra.mrb[0].mxu1 %vm231_vm2, %v307_v16 }
 0x2aa   : > { %v381_v18 = vpop.f32.mrb[0].mxu1 }
 0x2ab   : > { %v530_v19 = vmul.f32 -1.442695, %v381_v18  ;;  %v551_v20 = vpop.f32.mrb[1].mxu1 }
 0x2ad   : > { %623 = vpow2.f32 %v530_v19 }
 0x2b7   : > { %v624_v21 = vpop.eup %623 }
 0x2b8   : > { %v388_v22 = vadd.f32 1.0, %v624_v21 }
 0x2ba   : > { %625 = vrcp.f32 %v388_v22 }
 0x2c4   : > { %v626_v24 = vpop.eup %625 }
 0x2c5   : > { %v394_v25 = vrot.slane %v626_v24, %v393_v23 }
 0x2c7   : > { %396 = vbcast.lane.b32.xlu0 %v394_v25, 256 }
 0x339   : > { %v397_v30 = vpop.permute.xlu0 %396 }
 0x33a   : > { %v405_v31 = vrot.slane %v397_v30, %v404_v29 }
 0x33c   : > { %v407_v32 = vmul.f32 %v405_v31, %v212_v0 }
 0x33e   : > { %408 = vst [vmem:[%s211_s20] sm:$0xff] %v407_v32 }
 0x33f   : > { %726 = shalt.err (!%p723_p7)
}
 0x340   : > { %s727_s8 = scalar_lea.hbm %s1001_s28, 128  ;;  %s731_s11 = scalar_lea.hbm %s1048_s3, 256 }
 0x341   : > { %p728_p10 = scmp.ne.s32.totalorder %s1001_s28, %s727_s8  ;;  %p732_p0 = scmp.lt.u32.totalorder %s1001_s28, %s1048_s3 }
 0x342   : > { %p733_p11 = scmp.lt.u32.totalorder %s731_s11, %s727_s8  ;;  %p735_p2 = scmp.lt.u32.totalorder %s727_s8, %s1001_s28 }
 0x343   : > { %p729_p13 = pnand %p728_p10, %p931_p6 }
 0x344   : > { %p734_p9 = por %p733_p11, %p732_p0 }
 0x345   : > { %p730_p5 = pneg %p729_p13 }
 0x346   : > { %p736_p1 = por %p735_p2, %p734_p9 }
 0x348   : > { %p737_p4 = pnand %p736_p1, %p730_p5 }
 0x34a   : > { %740 = shalt.err (!%p737_p4)
}
 0x34b   : > { %562 = dma.vmem_to_hbm [thread:$0]  (%p931_p6), %s1003_s24, 128, %s1001_s28, %s410_s22  }
 0x34c PF: > { %s436_s29 = sand.u32 1, %s771_s12   ;;  %p1063_p8 = scmp.ne.s32.totalorder %s1053_s19, 0 }
 0x34d   : > { %p1064_p12 = scmp.ge.s32.totalorder %s783_s15, 2  ;;  %s437_s30 = scalar_lea.sflag [#allocation4], %s436_s29 }
 0x34f   : > { %p576_p3 = pnand %p1064_p12, %p1063_p8 }
 0x351   : > { %766 = dma.done.wait (!%p576_p3), %s437_s30, 128  }
 0x352   : > { %768 = vsyncadd (!%p576_p3), %s437_s30, 4294967168  ;;  %p17_p7 = scmp.ge.s32.totalorder %s868_s26, 4   ;;  %s1065_s12 = smov %s775_s13 }
 0x353   : > { %s1066_s13 = smov %s779_s14  ;;  %s1067_s14 = smov %s927_s25 }
 0x354   : > { %s1068_s15 = smov %s868_s26  ;;  %19 = sbr.rel (!%p17_p7) target bundleno = 6 (0x6), region = 85 }
 0x35b   :  { %442 = vsyncpa [#allocation3], 1 }
 0x35c   :  { %444 = vsyncpa [#allocation3 + $0x1], 1 }
 0x35d   :  { %445 = vsyncpa [#allocation6], 1 }
 0x35e   :  { %446 = vsyncpa [#allocation4], 1 }
 0x35f   :  { %448 = vsyncpa [#allocation4 + $0x1], 1 }

</bundles_post_ra>
